<compile_context>
chip_gen: v6e
topology: v6e:2x2x1
jax: 0.10.0
libtpu: 0.0.40
codegen_flags: <defaults>
</compile_context>

<pallas_src>
import jax
import jax.numpy as jnp
from jax.experimental import pallas as pl
from jax.experimental.pallas import tpu as pltpu


def fc2_kernel(x_ref, w1_ref, b1_ref, w2_ref, b2_ref, o_ref):
    # x arrives f32 (no wrapper-side bf16 copy in HBM); cast to bf16 here so the
    # MXU runs bf16 with f32 accumulation. In a mem-bound kernel the cast is free.
    xb = x_ref[...].astype(jnp.bfloat16)
    h = jnp.dot(xb, w1_ref[...], preferred_element_type=jnp.float32)
    h = jnp.maximum(h + b1_ref[...], 0.0)                 # b1 is [1, 100], broadcasts
    logits = jnp.dot(h, w2_ref[...], preferred_element_type=jnp.float32)
    logits = logits + b2_ref[...]                         # b2 is [1, 10]
    # Numerically stable log_softmax along the class dim (row-local, so any
    # garbage rows in a masked final block cannot contaminate valid rows).
    m = jnp.max(logits, axis=-1, keepdims=True)
    s = logits - m
    lse = jnp.log(jnp.sum(jnp.exp(s), axis=-1, keepdims=True))
    o_ref[...] = s - lse


def _round_up(x, m):
    return ((x + m - 1) // m) * m


def _vmem_capacity_bytes():
    """Trace-time VMEM capacity; falls back to the smallest (v7x per-TC) value."""
    try:
        return int(pltpu.get_tpu_info().vmem_capacity_bytes)
    except Exception:
        return 64 * 1024 * 1024


def fc2_forward(x_nchw, w1, b1, w2, b2, *, tm=None):
    """x_nchw: [B, 1, 28, 28] float32 -> [B, 10] log-probabilities (float32)."""
    B = x_nchw.shape[0]
    # nn.Flatten: row-major C*H*W = 784. Stays f32 — no bf16 copy in HBM.
    x_flat = x_nchw.reshape(B, -1)
    w1_bf16 = w1.astype(jnp.bfloat16)      # 784x100 bf16 ≈ 157 KB, negligible

    # Generation-aware tile cap / scoped-VMEM budget.
    if _vmem_capacity_bytes() >= 100 * 1024 * 1024:      # v5e / v6e: 128 MiB VMEM
        tm_max, vmem_limit = 4096, 48 * 1024 * 1024
    else:                                                # v7x: 64 MiB VMEM
        tm_max, vmem_limit = 2048, 32 * 1024 * 1024

    if tm is None:
        if B <= 512:
            # Genuinely small batch: one tile, rounded to a multiple of 16
            # (bf16 sublane packing). Partial/oversized block is masked by Pallas.
            tm = min(_round_up(max(B, 8), 16), tm_max)
        else:
            # At least 2 grid steps so v7x's two TensorCores both get work,
            # while keeping tiles large to amortize the ~0.35 us/step overhead.
            tm = min(tm_max, _round_up(pl.cdiv(B, 2), 256))

    # No jnp.pad: Pallas' cdiv grid masks the ragged final block (reads padded
    # with unspecified data, writes clipped to in-bounds rows).
    grid = (pl.cdiv(B, tm),)

    flops = 2 * B * (784 * 100 + 100 * 10)
    bytes_accessed = (
        B * 784 * 4                # x streamed as f32
        + 784 * 100 * 2            # w1 (bf16)
        + 100 * 4 + 100 * 10 * 4 + 10 * 4   # b1, w2, b2 (f32)
        + B * 10 * 4               # output (f32)
    )

    out = pl.pallas_call(
        fc2_kernel,
        out_shape=jax.ShapeDtypeStruct((B, 10), jnp.float32),
        grid=grid,
        in_specs=[
            pl.BlockSpec((tm, 784), lambda i: (i, 0)),    # x: streams per tile (f32)
            pl.BlockSpec((784, 100), lambda i: (0, 0)),   # w1: VMEM-resident (bf16)
            pl.BlockSpec((1, 100), lambda i: (0, 0)),     # b1: VMEM-resident
            pl.BlockSpec((100, 10), lambda i: (0, 0)),    # w2: VMEM-resident
            pl.BlockSpec((1, 10), lambda i: (0, 0)),      # b2: VMEM-resident
        ],
        out_specs=pl.BlockSpec((tm, 10), lambda i: (i, 0)),
        compiler_params=pltpu.CompilerParams(
            # Batch tiles are independent -> megacore sharding on v7x.
            dimension_semantics=("parallel",),
            vmem_limit_bytes=vmem_limit,
        ),
        cost_estimate=pl.CostEstimate(
            flops=flops,
            transcendentals=B * 10,
            bytes_accessed=bytes_accessed,
        ),
    )(x_flat, w1_bf16, b1, w2, b2)
    return out


def init_params(key):
    """Deterministic init mimicking nn.Linear default (uniform +/- 1/sqrt(fan_in))."""
    k1, k2, k3, k4 = jax.random.split(key, 4)
    bound1 = 1.0 / jnp.sqrt(784.0)
    bound2 = 1.0 / jnp.sqrt(100.0)
    # stored as [in, out] (transpose of PyTorch's [out, in])
    w1 = jax.random.uniform(k1, (784, 100), jnp.float32, -bound1, bound1)
    b1 = jax.random.uniform(k2, (1, 100), jnp.float32, -bound1, bound1)
    w2 = jax.random.uniform(k3, (100, 10), jnp.float32, -bound2, bound2)
    b2 = jax.random.uniform(k4, (1, 10), jnp.float32, -bound2, bound2)
    return w1, b1, w2, b2


if __name__ == "__main__":
    key = jax.random.PRNGKey(0)
    kx, kp = jax.random.split(key)

    B = 2
    x = jax.random.normal(kx, (B, 1, 28, 28), jnp.float32)   # NCHW like PyTorch
    w1, b1, w2, b2 = init_params(kp)

    out = fc2_forward(x, w1, b1, w2, b2)
    out = jax.block_until_ready(out)
    assert out.shape == (B, 10)

    # Reference matching the kernel's arithmetic (bf16 inputs, f32 accumulation).
    xf = x.reshape(B, -1)
    h = jnp.dot(xf.astype(jnp.bfloat16), w1.astype(jnp.bfloat16),
                preferred_element_type=jnp.float32) + b1
    h = jnp.maximum(h, 0.0)
    logits = jnp.dot(h, w2, preferred_element_type=jnp.float32) + b2
    ref_bf16 = jax.nn.log_softmax(logits, axis=-1)
    assert jnp.allclose(out, ref_bf16, atol=1e-4, rtol=1e-4)

    # Looser check against the pure-f32 PyTorch-equivalent forward.
    # (bf16 matmul inputs => ~1e-2 relative divergence from full-f32 is expected)
    ref_f32 = jax.nn.log_softmax(jnp.maximum(xf @ w1 + b1, 0.0) @ w2 + b2, axis=-1)
    assert jnp.allclose(out, ref_f32, atol=5e-2, rtol=5e-2)

    # Exercise the multi-tile + ragged (masked final block, no pre-pad) path.
    B2 = 37
    x2 = jax.random.normal(kx, (B2, 1, 28, 28), jnp.float32)
    out2 = jax.block_until_ready(fc2_forward(x2, w1, b1, w2, b2, tm=16))
    xf2 = x2.reshape(B2, -1)
    h2 = jnp.dot(xf2.astype(jnp.bfloat16), w1.astype(jnp.bfloat16),
                 preferred_element_type=jnp.float32) + b1
    ref2 = jax.nn.log_softmax(jnp.maximum(h2, 0.0) @ w2 + b2, axis=-1)
    assert out2.shape == (B2, 10)
    assert jnp.allclose(out2, ref2, atol=1e-4, rtol=1e-4)

    print("KERNEL_OK")
</pallas_src>

<mosaic_0001>
module attributes {stable_mosaic.version = 11 : i64} {
  func.func @fc2_kernel(%arg0: i32, %arg1: memref<16x784xf32, #tpu.memory_space<vmem>>, %arg2: memref<784x100xbf16, #tpu.memory_space<vmem>>, %arg3: memref<1x100xf32, #tpu.memory_space<vmem>>, %arg4: memref<100x10xf32, #tpu.memory_space<vmem>>, %arg5: memref<1x10xf32, #tpu.memory_space<vmem>>, %arg6: memref<16x10xf32, #tpu.memory_space<vmem>>) attributes {dimension_semantics = [#tpu.dimension_semantics<parallel>], iteration_bounds = array<i64: 1>, scalar_prefetch = 0 : i64, scratch_operands = 0 : i64, tpu.core_type = #tpu.core_type<tc>, window_params = [{transform_indices = @transform_0, window_bounds = array<i64: 16, 784>}, {pipeline_mode = #tpu.pipeline_mode<synchronous>, transform_indices = @transform_1, window_bounds = array<i64: 784, 100>}, {pipeline_mode = #tpu.pipeline_mode<synchronous>, transform_indices = @transform_2, window_bounds = array<i64: 1, 100>}, {pipeline_mode = #tpu.pipeline_mode<synchronous>, transform_indices = @transform_3, window_bounds = array<i64: 100, 10>}, {pipeline_mode = #tpu.pipeline_mode<synchronous>, transform_indices = @transform_4, window_bounds = array<i64: 1, 10>}, {transform_indices = @transform_5, window_bounds = array<i64: 16, 10>}]} {
    %c0 = arith.constant 0 : index
    %c0_0 = arith.constant 0 : index
    %0 = vector.load %arg1[%c0, %c0_0] : memref<16x784xf32, #tpu.memory_space<vmem>>, vector<16x784xf32>
    %1 = arith.truncf %0 : vector<16x784xf32> to vector<16x784xbf16>
    %c0_1 = arith.constant 0 : index
    %c0_2 = arith.constant 0 : index
    %2 = vector.load %arg2[%c0_1, %c0_2] : memref<784x100xbf16, #tpu.memory_space<vmem>>, vector<784x100xbf16>
    %cst = arith.constant dense<0.000000e+00> : vector<16x100xf32>
    %3 = tpu.matmul %1, %2, %cst {dimension_numbers = #tpu.dot_dimension_numbers<[1], [0], [0], [1], [0, 0, 1, 1], [], []>} : vector<16x784xbf16>, vector<784x100xbf16>, vector<16x100xf32> -> vector<16x100xf32>
    %c0_3 = arith.constant 0 : index
    %c0_4 = arith.constant 0 : index
    %4 = vector.load %arg3[%c0_3, %c0_4] : memref<1x100xf32, #tpu.memory_space<vmem>>, vector<1x100xf32>
    %5 = vector.broadcast %4 : vector<1x100xf32> to vector<16x100xf32>
    %6 = arith.addf %3, %5 : vector<16x100xf32>
    %cst_5 = arith.constant 0.000000e+00 : f32
    %7 = vector.broadcast %cst_5 : f32 to vector<16x100xf32>
    %8 = arith.maximumf %6, %7 : vector<16x100xf32>
    %c0_6 = arith.constant 0 : index
    %c0_7 = arith.constant 0 : index
    %9 = vector.load %arg4[%c0_6, %c0_7] : memref<100x10xf32, #tpu.memory_space<vmem>>, vector<100x10xf32>
    %cst_8 = arith.constant dense<0.000000e+00> : vector<16x10xf32>
    %10 = tpu.matmul %8, %9, %cst_8 {dimension_numbers = #tpu.dot_dimension_numbers<[1], [0], [0], [1], [0, 0, 1, 1], [], []>} : vector<16x100xf32>, vector<100x10xf32>, vector<16x10xf32> -> vector<16x10xf32>
    %c0_9 = arith.constant 0 : index
    %c0_10 = arith.constant 0 : index
    %11 = vector.load %arg5[%c0_9, %c0_10] : memref<1x10xf32, #tpu.memory_space<vmem>>, vector<1x10xf32>
    %12 = vector.broadcast %11 : vector<1x10xf32> to vector<16x10xf32>
    %13 = arith.addf %10, %12 : vector<16x10xf32>
    %cst_11 = arith.constant dense<0xFF800000> : vector<16xf32>
    %14 = vector.multi_reduction <maximumf>, %13, %cst_11 [1] : vector<16x10xf32> to vector<16xf32>
    %15 = vector.shape_cast %14 : vector<16xf32> to vector<16x1xf32>
    %16 = vector.broadcast %15 : vector<16x1xf32> to vector<16x10xf32>
    %17 = arith.subf %13, %16 : vector<16x10xf32>
    %18 = math.exp %17 : vector<16x10xf32>
    %cst_12 = arith.constant dense<0.000000e+00> : vector<16xf32>
    %19 = vector.multi_reduction <add>, %18, %cst_12 [1] : vector<16x10xf32> to vector<16xf32>
    %20 = vector.shape_cast %19 : vector<16xf32> to vector<16x1xf32>
    %21 = math.log %20 : vector<16x1xf32>
    %22 = vector.broadcast %21 : vector<16x1xf32> to vector<16x10xf32>
    %23 = arith.subf %17, %22 : vector<16x10xf32>
    %c0_13 = arith.constant 0 : index
    %c0_14 = arith.constant 0 : index
    %24 = vector.load %arg6[%c0_13, %c0_14] : memref<16x10xf32, #tpu.memory_space<vmem>>, vector<16x10xf32>
    tpu.vector_store %arg6[%c0_13, %c0_14], %23 {strides = array<i32>} : memref<16x10xf32, #tpu.memory_space<vmem>>, vector<16x10xf32>,
    return
  }
  func.func @transform_0(%arg0: i32) -> (i32, i32) {
    %c0_i32 = arith.constant 0 : i32
    %c0_i32_0 = arith.constant 0 : i32
    return %arg0, %c0_i32 : i32, i32
  }
  func.func @transform_1(%arg0: i32) -> (i32, i32) {
    %c0_i32 = arith.constant 0 : i32
    %c0_i32_0 = arith.constant 0 : i32
    %c0_i32_1 = arith.constant 0 : i32
    return %c0_i32, %c0_i32_0 : i32, i32
  }
  func.func @transform_2(%arg0: i32) -> (i32, i32) {
    %c0_i32 = arith.constant 0 : i32
    %c0_i32_0 = arith.constant 0 : i32
    %c0_i32_1 = arith.constant 0 : i32
    return %c0_i32, %c0_i32_0 : i32, i32
  }
  func.func @transform_3(%arg0: i32) -> (i32, i32) {
    %c0_i32 = arith.constant 0 : i32
    %c0_i32_0 = arith.constant 0 : i32
    %c0_i32_1 = arith.constant 0 : i32
    return %c0_i32, %c0_i32_0 : i32, i32
  }
  func.func @transform_4(%arg0: i32) -> (i32, i32) {
    %c0_i32 = arith.constant 0 : i32
    %c0_i32_0 = arith.constant 0 : i32
    %c0_i32_1 = arith.constant 0 : i32
    return %c0_i32, %c0_i32_0 : i32, i32
  }
  func.func @transform_5(%arg0: i32) -> (i32, i32) {
    %c0_i32 = arith.constant 0 : i32
    %c0_i32_0 = arith.constant 0 : i32
    return %arg0, %c0_i32 : i32, i32
  }
}

</mosaic_0001>

<bundles_post_ra>
// kernel: tpu_custom_call.1
= control target key start
LH: loop header
LB: loop body
LE: loop exit
PB: predicated region body
PF: predicated region fallthrough
CT: control target
= control target key end

     0   :  { %10 = vsyncpa [#allocation3], 0  ;;  %v61_v28 = vlaneseq  ;;  %v1217_v32 = vmov 1983009808   ;;  %v1218_v53 = vmov 0.0   ;;  %vm1219_vm0 = vmmov 0   ;;  %s1520_s0 = inlined_call_operand.vmem [shape: f32[2,784], index: 0, kind: input, shape index: {}]   ;;  %s1521_s1 = inlined_call_operand.vmem [shape: bf16[784,100], index: 1, kind: input, shape index: {}]   ;;  %s1522_s2 = inlined_call_operand.vmem [shape: f32[1,100], index: 2, kind: input, shape index: {}]   ;;  %s1523_s3 = inlined_call_operand.vmem [shape: f32[100,10], index: 3, kind: input, shape index: {}]   ;;  %s1524_s4 = inlined_call_operand.vmem [shape: f32[1,10], index: 4, kind: input, shape index: {}]   ;;  %s1525_s5 = inlined_call_operand.hbm [shape: f32[2,10], index: 5, kind: output, shape index: {}]  }
   0x1   :  { %v1114_v0 = vld [vmem:[%s1521_s1 + $0x78] sm:$0xff]   ;;  %v1118_v4 = vld [vmem:[%s1521_s1 + $0x70] sm:$0xff]   ;;  %v1122_v8 = vld [vmem:[%s1521_s1 + $0x68] sm:$0xff]   ;;  %v59_v33 = vunpack.c.l.s4 %v1217_v32  ;;  %vm616_vm1 = vcmask 130048   ;;  %vm813_vm2 = vcmask 1043456   ;;  %vm806_vm3 = vcmask 818176  }
   0x2   :  { %v1115_v1 = vld [vmem:[%s1521_s1 + $0x38] sm:$0xff]   ;;  %990 = vmatprep.subr.bf16.mxu0 %v1114_v0  ;;  %v1119_v5 = vld [vmem:[%s1521_s1 + $0x30] sm:$0xff]   ;;  %v1123_v9 = vld [vmem:[%s1521_s1 + $0x28] sm:$0xff]   ;;  %v62_v34 = vshrl.u32 %v61_v28, 7  ;;  %vm892_vm4 = vcmask 80896  }
   0x3   :  { %v1116_v2 = vld [vmem:[%s1521_s1 + $0xf8] sm:$0xff]   ;;  %991 = vmatpush3.bf16.msra.mxu0 %v1115_v1  ;;  %v1120_v6 = vld [vmem:[%s1521_s1 + $0xf0] sm:$0xff]   ;;  %v1124_v10 = vld [vmem:[%s1521_s1 + $0xe8] sm:$0xff]   ;;  %v60_v37 = vunpack.c.0.s8 %v59_v33 }
   0x4   :  { %v1117_v3 = vld [vmem:[%s1521_s1 + $0xb8] sm:$0xff]   ;;  %1012 = vmatprep.subr.bf16.mxu1 %v1116_v2  ;;  %992 = vmatprep.subr.bf16.mxu0 %v1118_v4  ;;  %v1121_v7 = vld [vmem:[%s1521_s1 + $0xb0] sm:$0xff]   ;;  %v1125_v11 = vld [vmem:[%s1521_s1 + $0xa8] sm:$0xff]  }
   0x5   :  { %1013 = vmatpush3.bf16.msra.mxu1 %v1117_v3  ;;  %v1126_v12 = vld [vmem:[%s1521_s1 + $0x60] sm:$0xff]   ;;  %v1130_v16 = vld [vmem:[%s1521_s1 + $0x58] sm:$0xff]   ;;  %v1134_v20 = vld [vmem:[%s1521_s1 + $0x50] sm:$0xff]   ;;  %v1358_v40 = vsub.s32 %v60_v37, %v62_v34 }
   0x6   :  { %1014 = vmatprep.subr.bf16.mxu1 %v1120_v6  ;;  %v1127_v13 = vld [vmem:[%s1521_s1 + $0x20] sm:$0xff]   ;;  %v1131_v17 = vld [vmem:[%s1521_s1 + $0x18] sm:$0xff]   ;;  %v1135_v21 = vld [vmem:[%s1521_s1 + $0x10] sm:$0xff]  }
   0x7   :  { %993 = vmatpush3.bf16.msra.mxu0 %v1119_v5  ;;  %v1128_v14 = vld [vmem:[%s1521_s1 + $0xe0] sm:$0xff]   ;;  %v1132_v18 = vld [vmem:[%s1521_s1 + $0xd8] sm:$0xff]   ;;  %v1136_v22 = vld [vmem:[%s1521_s1 + $0xd0] sm:$0xff]  }
   0x8   :  { %994 = vmatprep.subr.bf16.mxu0 %v1122_v8  ;;  %v1129_v15 = vld [vmem:[%s1521_s1 + $0xa0] sm:$0xff]   ;;  %v1133_v19 = vld [vmem:[%s1521_s1 + $0x98] sm:$0xff]   ;;  %v1137_v23 = vld [vmem:[%s1521_s1 + $0x90] sm:$0xff]  }
   0x9   :  { %1015 = vmatpush3.bf16.msra.mxu1 %v1121_v7  ;;  %v1138_v24 = vld [vmem:[%s1521_s1 + $0x48] sm:$0xff]   ;;  %v1142_v29 = vld [vmem:[%s1521_s1 + $0x40] sm:$0xff]   ;;  %v1154_v42 = vld [vmem:[%s1521_s1 + $0x178] sm:$0xff]  }
   0xa   :  { %1016 = vmatprep.subr.bf16.mxu1 %v1124_v10  ;;  %v1139_v25 = vld [vmem:[%s1521_s1 + $0x8] sm:$0xff]   ;;  %v1143_v30 = vld [vmem:[%s1521_s1] sm:$0xff]   ;;  %v1159_v0 = vld [vmem:[%s1521_s1 + $0x138] sm:$0xff]  }
   0xb   :  { %995 = vmatpush3.bf16.msra.mxu0 %v1123_v9  ;;  %v1140_v26 = vld [vmem:[%s1521_s1 + $0xc8] sm:$0xff]   ;;  %v1144_v31 = vld [vmem:[%s1521_s1 + $0xc0] sm:$0xff]   ;;  %v1160_v3 = vld [vmem:[%s1521_s1 + $0x170] sm:$0xff]  }
   0xc   :  { %996 = vmatprep.subr.bf16.mxu0 %v1126_v12  ;;  %v1141_v27 = vld [vmem:[%s1521_s1 + $0x88] sm:$0xff]   ;;  %v1151_v39 = vld [vmem:[%s1520_s0 + $0x54] ss:$14 sps:$4 sm:$0xff]  }
   0xd   :  { %1017 = vmatpush3.bf16.msra.mxu1 %v1125_v11  ;;  %v1145_v35 = vld [vmem:[%s1520_s0] ss:$14 sps:$4 sm:$0xff]   ;;  %v1147_v36 = vld [vmem:[%s1520_s0 + $0x1c] ss:$14 sps:$4 sm:$0xff]   ;;  %v1149_v38 = vld [vmem:[%s1520_s0 + $0x38] ss:$14 sps:$4 sm:$0xff]   ;;  %v149_v48 = vrot.slane %v1151_v39, %v1358_v40 }
   0xe   :  { %1018 = vmatprep.subr.bf16.mxu1 %v1128_v14  ;;  %v1153_v41 = vld [vmem:[%s1521_s1 + $0x80] sm:$0xff]   ;;  %v64_v45 = vrot.slane %v1145_v35, %v1358_v40  ;;  %v78_v46 = vrot.slane %v1147_v36, %v1358_v40  ;;  %v135_v47 = vrot.slane %v1149_v38, %v1358_v40  ;;  %v1157_v49 = vld [vmem:[%s1520_s0 + $0x3c] ss:$14 sps:$4 sm:$0xff]   ;;  %v1161_v6 = vld [vmem:[%s1521_s1 + $0x130] sm:$0xff]  }
   0xf   :  { %997 = vmatpush3.bf16.msra.mxu0 %v1127_v13  ;;  %v1155_v43 = vld [vmem:[%s1520_s0 + $0x4] ss:$14 sps:$4 sm:$0xff]   ;;  %v1156_v44 = vld [vmem:[%s1520_s0 + $0x20] ss:$14 sps:$4 sm:$0xff]   ;;  %v142_v59 = vrot.slane %v1157_v49, %v1358_v40  ;;  %v1166_v11 = vld [vmem:[%s1521_s1 + $0x158] sm:$0xff]  }
  0x10   :  { %998 = vmatprep.subr.bf16.mxu0 %v1130_v16  ;;  %v1158_v50 = vld [vmem:[%s1520_s0 + $0x58] ss:$14 sps:$4 sm:$0xff]   ;;  %v71_v51 = vrot.slane %v1155_v43, %v1358_v40  ;;  %v85_v52 = vrot.slane %v1156_v44, %v1358_v40  ;;  %v87_v54 = vcombine.high %v64_v45, %v78_v46  ;;  %v158_v55 = vcombine.high %v135_v47, %v149_v48 }
  0x11   :  { %1019 = vmatpush3.bf16.msra.mxu1 %v1129_v15  ;;  %v86_v56 = vcombine.low %v64_v45, %v78_v46  ;;  %v157_v57 = vcombine.low %v135_v47, %v149_v48  ;;  %v156_v60 = vrot.slane %v1158_v50, %v1358_v40  ;;  %v1162_v7 = vld [vmem:[%s1521_s1 + $0x168] sm:$0xff]   ;;  %v1164_v9 = vld [vmem:[%s1521_s1 + $0x160] sm:$0xff]   ;;  %v1167_v13 = vld [vmem:[%s1521_s1 + $0x118] sm:$0xff]  }
  0x12   :  { %1020 = vmatprep.subr.bf16.mxu1 %v1132_v18  ;;  %v89_v58 = vcombine.high %v71_v51, %v85_v52  ;;  %v88_v61 = vcombine.low %v71_v51, %v85_v52  ;;  %v211_v62 = vpack.c.bf16 %v158_v55, %v87_v54  ;;  %v1163_v8 = vld [vmem:[%s1521_s1 + $0x128] sm:$0xff]   ;;  %v1165_v10 = vld [vmem:[%s1521_s1 + $0x120] sm:$0xff]   ;;  %v1168_v18 = vld [vmem:[%s1521_s1 + $0x150] sm:$0xff]  }
  0x13   :  { %999 = vmatpush3.bf16.msra.mxu0 %v1131_v17  ;;  %v210_v63 = vpack.c.bf16 %v157_v57, %v86_v56  ;;  %v160_v1 = vcombine.high %v142_v59, %v156_v60  ;;  %v159_v2 = vcombine.low %v142_v59, %v156_v60  ;;  %v1174_v12 = vld [vmem:[%s1521_s1 + $0x180] sm:$0xff]   ;;  %v1175_v14 = vld [vmem:[%s1520_s0 + $0x8] ss:$14 sps:$4 sm:$0xff]   ;;  %v1177_v16 = vld [vmem:[%s1520_s0 + $0xc] ss:$14 sps:$4 sm:$0x33]  }
  0x14   :  { %1000 = vmatprep.subr.bf16.mxu0 %v1134_v20  ;;  %652 = vmatprep.mubr.bf16.mxu0 %v211_v62  ;;  %v1178_v15 = vld [vmem:[%s1520_s0 + $0x24] ss:$14 sps:$4 sm:$0xff]   ;;  %v1180_v17 = vld [vmem:[%s1520_s0 + $0x28] ss:$14 sps:$4 sm:$0x33]   ;;  %v797_v46 = vld [vmem:[%s1523_s3 + $0x58] sm:$0xff] }
  0x15   :  { %1021 = vmatpush3.bf16.msra.mxu1 %v1133_v19  ;;  %v213_v4 = vpack.c.bf16 %v160_v1, %v89_v58  ;;  %v212_v5 = vpack.c.bf16 %v159_v2, %v88_v61  ;;  %v100_v19 = vrot.slane %v1175_v14, %v1358_v40  ;;  %v114_v20 = vrot.slane %v1178_v15, %v1358_v40  ;;  %v1170_v34 = vld [vmem:[%s1521_s1 + $0x148] sm:$0xff]   ;;  %v1173_v43 = vld [vmem:[%s1521_s1 + $0x100] sm:$0xff]   ;;  %v796_v47 = vld [vmem:[%s1523_s3 + $0x50] sm:$0xff] }
  0x16   :  { %1022 = vmatprep.subr.bf16.mxu1 %v1136_v22  ;;  %v1183_v22 = vld [vmem:[%s1520_s0 + $0x44] ss:$14 sps:$4 sm:$0x33]   ;;  %v1171_v37 = vld [vmem:[%s1521_s1 + $0x108] sm:$0xff]   ;;  %v798_v45 = vld [vmem:[%s1523_s3 + $0x60] sm:$0xf] }
  0x17   :  { %1001 = vmatpush3.bf16.msra.mxu0 %v1135_v21  ;;  %693 = vmatprep.mubr.bf16.mxu1 %v213_v4  ;;  %v1181_v21 = vld [vmem:[%s1520_s0 + $0x40] ss:$14 sps:$4 sm:$0xff]   ;;  %v178_v28 = vrot.slane %v1183_v22, %v1358_v40  ;;  %v793_v50 = vld [vmem:[%s1523_s3 + $0x38] sm:$0xff] }
  0x18   :  { %1002 = vmatprep.subr.bf16.mxu0 %v1138_v24  ;;  %v121_v24 = vrot.slane %v1180_v17, %v1358_v40  ;;  %v795_v48 = vld [vmem:[%s1523_s3 + $0x48] sm:$0xff]  ;;  %v794_v49 = vld [vmem:[%s1523_s3 + $0x40] sm:$0xff]  ;;  %v792_v51 = vld [vmem:[%s1523_s3 + $0x30] sm:$0xff] }
  0x19   :  { %1023 = vmatpush3.bf16.msra.mxu1 %v1137_v23  ;;  %v107_v23 = vrot.slane %v1177_v16, %v1358_v40  ;;  %v791_v52 = vld [vmem:[%s1523_s3 + $0x28] sm:$0xff]  ;;  %v789_v54 = vld [vmem:[%s1523_s3 + $0x18] sm:$0xff]  ;;  %v788_v55 = vld [vmem:[%s1523_s3 + $0x10] sm:$0xff] }
  0x1a   :  { %1024 = vmatprep.subr.bf16.mxu1 %v1140_v26  ;;  %v1186_v26 = vld [vmem:[%s1520_s0 + $0x60] ss:$14 sps:$4 sm:$0x33]  }
  0x1b   :  { %1003 = vmatpush3.bf16.msra.mxu0 %v1139_v25  ;;  %v1184_v25 = vld [vmem:[%s1520_s0 + $0x5c] ss:$14 sps:$4 sm:$0xff]   ;;  %v192_v32 = vrot.slane %v1186_v26, %v1358_v40  ;;  %v124_v33 = vcombine.low %v107_v23, %v121_v24  ;;  %v786_v57 = vld [vmem:[%s1523_s3] sm:$0xff] }
  0x1c   :  { %1004 = vmatprep.subr.bf16.mxu0 %v1142_v29  ;;  %v1169_v29 = vld [vmem:[%s1521_s1 + $0x110] sm:$0xff]   ;;  %v787_v56 = vld [vmem:[%s1523_s3 + $0x8] sm:$0xff] }
  0x1d   :  { %1025 = vmatpush3.bf16.msra.mxu1 %v1141_v27  ;;  %v171_v27 = vrot.slane %v1181_v21, %v1358_v40  ;;  %v195_v36 = vcombine.low %v178_v28, %v192_v32  ;;  %v986_v28 = vld [vmem:[%s1524_s4] ss:$0 sm:$0xff] }
  0x1e   :  { %1026 = vmatprep.subr.bf16.mxu1 %v1144_v31  ;;  %v185_v31 = vrot.slane %v1184_v25, %v1358_v40  ;;  %v1172_v40 = vld [vmem:[%s1521_s1 + $0x140] sm:$0xff]  }
  0x1f   :  { %1005 = vmatpush3.bf16.msra.mxu0 %v1143_v30  ;;  %v123_v30 = vcombine.high %v100_v19, %v114_v20  ;;  %v216_v39 = vpack.c.bf16 %v195_v36, %v124_v33 }
  0x20   :  { %1034 = vmatprep.subr.bf16.mxu0 %v1154_v42  ;;  %v194_v35 = vcombine.high %v171_v27, %v185_v31  ;;  %v193_v42 = vcombine.low %v171_v27, %v185_v31 }
  0x21   :  { %1027 = vmatpush3.bf16.msra.mxu1 %v1153_v41  ;;  %v122_v41 = vcombine.low %v100_v19, %v114_v20 }
  0x22   :  { %1073 = vmatprep.subr.bf16.mxu1 %v1218_v53  ;;  %653 = vmatmul.mubr.bf16.vlgmr.msra.gmra.mxu0 %v210_v63  ;;  %v215_v38 = vpack.c.bf16 %v194_v35, %v123_v30 }
  0x23   :  { %1035 = vmatpush3.bf16.msra.mxu0 %v1159_v0  ;;  %v214_v44 = vpack.c.bf16 %v193_v42, %v122_v41 }
  0x24   :  { %1036 = vmatprep.subr.bf16.mxu0 %v1160_v3  ;;  %694 = vmatmul.mubr.bf16.vlgmr.msra.gmra.mxu1 %v212_v5  ;;  %v935_v5 = vld [vmem:[%s1522_s2] ss:$0 sm:$0xff] }
  0x25   :  { %1075 = vmatprep.mubr.msk.bf16.mxu1 %vm1219_vm0, %v1218_v53  ;;  %1074 = vmatpush3.bf16.msra.mxu1 %v1174_v12  ;;  %v790_v53 = vld [vmem:[%s1523_s3 + $0x20] sm:$0xff] }
  0x26   :  { %734 = vmatprep.mubr.bf16.mxu0 %v215_v38  ;;  %1079 = vmatprep.subr.msk.mxu1 %vm813_vm2, %v798_v45 }
  0x27   :  { %1037 = vmatpush3.bf16.msra.mxu0 %v1161_v6 }
  0x28   :  { %1038 = vmatprep.subr.bf16.mxu0 %v1162_v7 }
  0x2b   :  { %1039 = vmatpush3.bf16.msra.mxu0 %v1163_v8 }
  0x2c   :  { %1040 = vmatprep.subr.bf16.mxu0 %v1164_v9  ;;  %1076 = vmatmul.mubr.msk.bf16.vlgmr.msra.gmra.mxu1 %vm616_vm1, %v216_v39 }
  0x2d   :  { %1080 = vmatpush3.msk.msra.mxu1 %vm813_vm2, %v798_v45 }
  0x2e   :  { %1081 = vmatprep.subr.mxu1 %v797_v46 }
  0x2f   :  { %1041 = vmatpush3.bf16.msra.mxu0 %v1165_v10  ;;  %1082 = vmatpush3.msra.mxu1 %v797_v46 }
  0x30   :  { %1042 = vmatprep.subr.bf16.mxu0 %v1166_v11  ;;  %1083 = vmatprep.subr.mxu1 %v796_v47 }
  0x31   :  { %1084 = vmatpush3.msra.mxu1 %v796_v47 }
  0x32   :  { %1085 = vmatprep.subr.mxu1 %v795_v48 }
  0x33   :  { %1043 = vmatpush3.bf16.msra.mxu0 %v1167_v13  ;;  %1086 = vmatpush3.msra.mxu1 %v795_v48 }
  0x34   :  { %1044 = vmatprep.subr.bf16.mxu0 %v1168_v18  ;;  %1087 = vmatprep.subr.mxu1 %v794_v49 }
  0x35   :  { %1088 = vmatpush3.msra.mxu1 %v794_v49 }
  0x36   :  { %1089 = vmatprep.subr.mxu1 %v793_v50 }
  0x37   :  { %1045 = vmatpush3.bf16.msra.mxu0 %v1169_v29  ;;  %1090 = vmatpush3.msra.mxu1 %v793_v50 }
  0x38   :  { %1046 = vmatprep.subr.bf16.mxu0 %v1170_v34  ;;  %1091 = vmatprep.subr.mxu1 %v792_v51 }
  0x39   :  { %1092 = vmatpush3.msra.mxu1 %v792_v51 }
  0x3a   :  { %1093 = vmatprep.subr.mxu1 %v791_v52 }
  0x3b   :  { %1047 = vmatpush3.bf16.msra.mxu0 %v1171_v37  ;;  %1094 = vmatpush3.msra.mxu1 %v791_v52 }
  0x3c   :  { %1048 = vmatprep.subr.bf16.mxu0 %v1172_v40  ;;  %1095 = vmatprep.subr.mxu1 %v790_v53 }
  0x3d   :  { %1096 = vmatpush3.msra.mxu1 %v790_v53 }
  0x3e   :  { %1097 = vmatprep.subr.mxu1 %v789_v54 }
  0x3f   :  { %1049 = vmatpush3.bf16.msra.mxu0 %v1173_v43  ;;  %1098 = vmatpush3.msra.mxu1 %v789_v54 }
  0x40   :  { %1099 = vmatprep.subr.mxu1 %v788_v55 }
  0x41   :  { %1100 = vmatpush3.msra.mxu1 %v788_v55 }
  0x42   :  { %735 = vmatmul.mubr.bf16.vlgmr.msra.gmra.mxu0 %v214_v44  ;;  %1101 = vmatprep.subr.mxu1 %v787_v56 }
  0x43   :  { %1102 = vmatpush3.msra.mxu1 %v787_v56 }
  0x44   :  { %1103 = vmatprep.subr.mxu1 %v786_v57 }
  0x45   :  { %1104 = vmatpush3.msra.mxu1 %v786_v57 }
  0xe2   :  { %v1006_v60 = vpop.f32.mrf.mxu0 }
  0xe4   :  { %v1028_v58 = vpop.f32.mrf.mxu1  ;;  %v1007_v62 = vpop.f32.mrf.mxu0 }
  0xe5   :  { %v1008_v3 = vadd.f32 %v1007_v62, %v1006_v60 }
  0xe6   :  { %v1029_v59 = vpop.f32.mrf.mxu1  ;;  %v1009_v1 = vpop.f32.mrf.mxu0 }
  0xe7   :  { %v655_v8 = vadd.f32 %v1008_v3, %v935_v5  ;;  %v1030_v9 = vadd.f32 %v1029_v59, %v1028_v58 }
  0xe8   :  { %v1031_v61 = vpop.f32.mrf.mxu1  ;;  %v1010_v6 = vpop.f32.mrf.mxu0 }
  0xe9   :  { %v1011_v10 = vadd.f32 %v1010_v6, %v1009_v1  ;;  %v696_v13 = vadd.f32 %v1030_v9, %v655_v8 }
  0xea   :  { %v1032_v63 = vpop.f32.mrf.mxu1 }
  0xeb   :  { %v658_v14 = vadd.f32 %v1011_v10, %v935_v5  ;;  %v1033_v15 = vadd.f32 %v1032_v63, %v1031_v61 }
  0xec   :  { %v777_v0 = vpop.f32.mrf.mxu1 }
  0xed   :  { %v699_v20 = vadd.f32 %v1033_v15, %v658_v14 }
  0xee   :  { %v1077_v2 = vpop.f32.mrf.mxu1 }
  0xf0   :  { %v780_v4 = vpop.f32.mrf.mxu1 }
  0xf2   :  { %v1078_v7 = vpop.f32.mrf.mxu1 }
 0x102   :  { %v1050_v11 = vpop.f32.mrf.mxu0 }
 0x104   :  { %v1051_v12 = vpop.f32.mrf.mxu0 }
 0x105   :  { %v1052_v16 = vadd.f32 %v1051_v12, %v1050_v11 }
 0x106   :  { %v1053_v17 = vpop.f32.mrf.mxu0 }
 0x107   :  { %v737_v18 = vadd.f32 %v1052_v16, %v696_v13 }
 0x108   :  { %v1054_v19 = vpop.f32.mrf.mxu0 }
 0x109   :  { %v778_v21 = vadd.f32 %v777_v0, %v737_v18  ;;  %v1055_v22 = vadd.f32 %v1054_v19, %v1053_v17 }
 0x10b   :  { %v784_v23 = vmax.f32 %v778_v21, 0.0  ;;  %v740_v24 = vadd.f32 %v1055_v22, %v699_v20 }
 0x10d   :  { %v781_v25 = vadd.f32 %v780_v4, %v740_v24  ;;  %1105 = vmatprep.mubr.msk.f32.mxu1 %vm806_vm3, %v784_v23 }
 0x10f   :  { %v785_v26 = vmax.f32 %v781_v25, 0.0 }
 0x111   :  { %1106 = vmatmul.mubr.msk.f32.vlgmr.msra.gmra.mxu1 %vm806_vm3, %v785_v26 }
 0x1d1   :  { %v1107_v27 = vpop.f32.mrf.mxu1 }
 0x1d2   :  { %v889_v31 = vadd.f32 %v1107_v27, %v986_v28 }
 0x1d3   :  { %v883_v29 = vpop.f32.mrf.mxu1 }
 0x1d4   :  { %v884_v30 = vadd.f32 %v986_v28, %v883_v29  ;;  %v896_v33 = vsel %vm892_vm4, %v889_v31, -inf }
 0x1d6   :  { %v893_v32 = vsel %vm892_vm4, %v884_v30, -inf }
 0x1d7   :  { %894 = vmax.xlane.f32.xlu0 %v893_v32 }
 0x1db   :  { %897 = vmax.xlane.f32.xlu0 %v896_v33 }
 0x260   :  { %v895_v34 = vpop.xlane.xlu0 %894 }
 0x261   :  { %v899_v35 = vsub.f32 %v884_v30, %v895_v34 }
 0x263   :  { %v901_v36 = vmul.f32 1.442695, %v899_v35 }
 0x264   :  { %v898_v37 = vpop.xlane.xlu0 %897 }
 0x265   :  { %1187 = vpow2.f32 %v901_v36  ;;  %v900_v38 = vsub.f32 %v889_v31, %v898_v37 }
 0x267   :  { %v903_v39 = vmul.f32 1.442695, %v900_v38 }
 0x269   :  { %1189 = vpow2.f32 %v903_v39 }
 0x272   :  { %v1188_v40 = vpop.eup %1187 }
 0x273   :  { %v905_v41 = vsel %vm892_vm4, %v1188_v40, 0.0 }
 0x274   :  { %906 = vadd.xlane.f32.xlu1 %v905_v41 }
 0x276   :  { %v1190_v42 = vpop.eup %1189 }
 0x277   :  { %v908_v43 = vsel %vm892_vm4, %v1190_v42, 0.0 }
 0x278   :  { %909 = vadd.xlane.f32.xlu1 %v908_v43 }
 0x2fd   :  { %v907_v44 = vpop.xlane.xlu1 %906 }
 0x2fe   :  { %1191 = vlog2.f32 %v907_v44 }
 0x301   :  { %v910_v45 = vpop.xlane.xlu1 %909 }
 0x302   :  { %1193 = vlog2.f32 %v910_v45 }
 0x30b   :  { %v1192_v46 = vpop.eup %1191 }
 0x30c   :  { %v912_v47 = vmul.f32 0.6931472, %v1192_v46 }
 0x30e   :  { %v915_v48 = vsub.f32 %v899_v35, %v912_v47 }
 0x30f   :  { %v1194_v49 = vpop.eup %1193 }
 0x310   :  { %917 = vst.msk [vmem:[#allocation2] sm:$0xff] %vm892_vm4, %v915_v48  ;;  %v914_v50 = vmul.f32 0.6931472, %v1194_v49 }
 0x312   :  { %v916_v51 = vsub.f32 %v900_v38, %v914_v50 }
 0x314   :  { %918 = vst.msk [vmem:[#allocation2 + $0x8] sm:$0xff] %vm892_vm4, %v916_v51 }
 0x315   :  { %923 = vsyncadd [#allocation3], 224  ;;  %s1220_s4 = smov [#allocation2]  }
 0x316   :  { %s924_s23 = sshll.u32 %s1220_s4, 4  ;;  %s925_s23 = int_to_ptr.vmem [resolvable:$true] %s924_s23 }
 0x317   :  { %s1195_s24 = scalar_lea.vmem %s925_s23, 32  ;;  %s1199_s25 = scalar_lea.vmem %s925_s23, 256 }
 0x318   :  { %p1196_p0 = scmp.ne.s32.totalorder %s925_s23, %s1195_s24  ;;  %p1200_p1 = scmp.lt.s32.totalorder %s925_s23, %s925_s23 }
 0x319   :  { %p1201_p2 = scmp.lt.s32.totalorder %s1199_s25, %s1195_s24 }
 0x31b   :  { %p1202_p3 = por %p1201_p2, %p1200_p1 }
 0x31d   :  { %p1203_p4 = pnand %p1202_p3, %p1196_p0 }
 0x31f   :  { %1206 = shalt.err (!%p1203_p4)
}
 0x320   :  { %s1221_s26 = smov 32   ;;  %s1222_s27 = smov 2  }
 0x321   :  { %930 = dma.vmem_to_hbm [thread:$0]  %s925_s23, 32, %s1525_s5, [#allocation3], %s1221_s26, %s1221_s26, %s1222_s27  }
 0x322   :  { %1215 = dma.done.wait [#allocation3], 256  }
 0x323   :  { %1216 = vsyncadd [#allocation3], 4294967040 }
 0x324   :  { %934 = vsyncpa [#allocation3], 1 }

</bundles_post_ra>
